<compile_context>
chip_gen: v5e
topology: v5e:2x2
jax: 0.10.0
libtpu: 0.0.40
codegen_flags: <defaults>
</compile_context>

<pallas_src>
import numpy as np
import jax
import jax.numpy as jnp
from jax.experimental import pallas as pl
from jax.experimental.pallas import tpu as pltpu

EPS = 1e-5
_MAX_TILE = 65536                 # batch samples per grid step (lane dim, mult of 128)
_VMEM_LIMIT = 32 * 1024 * 1024    # comfortable on v5e/v6e/v7x


def _round_up(v, m):
    return (v + m - 1) // m * m


def _stats_kernel(n_ref, x_ref, a_ref, cb_ref, sum_ref, sq_ref):
    """conv1 -> ReLU -> AvgPool2d(2,2) (feature-major) + BN stats accumulation."""
    i = pl.program_id(0)
    tile = x_ref.shape[1]

    @pl.when(i == 0)
    def _():
        sum_ref[...] = jnp.zeros_like(sum_ref)
        sq_ref[...] = jnp.zeros_like(sq_ref)

    # conv1 (2x2 kernel, pad=1) as one small matmul against a constant (96, 9)
    # matrix; rows ordered (dh, dw, c, ph, pw); batch is in lanes.
    conv = jnp.dot(a_ref[...], x_ref[...], preferred_element_type=jnp.float32)
    conv = jnp.maximum(conv + cb_ref[...], 0.0)                    # ReLU
    # AvgPool2d(2,2): four sublane-aligned 24-row slice adds; result rows are
    # already in PyTorch Flatten order c*4 + ph*2 + pw.
    pooled = 0.25 * (conv[0:24] + conv[24:48] + conv[48:72] + conv[72:96])

    last = i == pl.num_programs(0) - 1

    @pl.when(jnp.logical_not(last))
    def _():
        sum_ref[...] += jnp.sum(pooled, axis=1, keepdims=True)
        sq_ref[...] += jnp.sum(pooled * pooled, axis=1, keepdims=True)

    @pl.when(last)
    def _():
        # Only the (possibly ragged) last tile needs masking; use select (not
        # multiply) so garbage in out-of-bounds lanes can never poison the sums.
        lane = jax.lax.broadcasted_iota(jnp.int32, pooled.shape, 1)
        valid = lane < (n_ref[0] - i * tile)
        pm = jnp.where(valid, pooled, 0.0)
        pm2 = jnp.where(valid, pooled * pooled, 0.0)
        sum_ref[...] += jnp.sum(pm, axis=1, keepdims=True)
        sq_ref[...] += jnp.sum(pm2, axis=1, keepdims=True)


def _mlp_kernel(x_ref, a_ref, cb_ref, w1_ref, b1_ref, w2_ref, b2_ref, o_ref):
    """Recompute conv+ReLU+pool, then (BN folded into w1/b1) -> fc1 -> ReLU -> fc2."""
    conv = jnp.dot(a_ref[...], x_ref[...], preferred_element_type=jnp.float32)
    conv = jnp.maximum(conv + cb_ref[...], 0.0)                    # ReLU
    pooled = 0.25 * (conv[0:24] + conv[24:48] + conv[48:72] + conv[72:96])
    h = jnp.dot(w1_ref[...], pooled, preferred_element_type=jnp.float32) + b1_ref[...]
    h = jnp.maximum(h, 0.0)                                        # ReLU
    o_ref[...] = jnp.dot(w2_ref[...], h, preferred_element_type=jnp.float32) + b2_ref[...]


def net_forward(x, params):
    N = x.shape[0]
    assert x.shape[1:] == (1, 3, 3), "fc1(24,.) implies input (N, 1, 3, 3)"

    # Feature-major / batch-in-lanes layout (one-time transpose in the wrapper).
    xT = x.reshape(N, 9).T                                   # (9, N)

    # Tile choice: a single full-extent block for N <= _MAX_TILE (no boundary
    # block at all), otherwise 64K-sample lane tiles with a clamped last block.
    tile = N if N <= _MAX_TILE else _MAX_TILE
    num_tiles = pl.cdiv(N, tile)

    n_dev = jnp.array([N], dtype=jnp.int32)                  # SMEM scalar (no recompile)

    full = lambda i, n: (0, 0)
    s24, sq24 = pl.pallas_call(
        _stats_kernel,
        grid_spec=pltpu.PrefetchScalarGridSpec(
            num_scalar_prefetch=1,
            grid=(num_tiles,),
            in_specs=[
                pl.BlockSpec((9, tile), lambda i, n: (0, i)),
                pl.BlockSpec((96, 9), full),
                pl.BlockSpec((96, 1), full),
            ],
            out_specs=[
                pl.BlockSpec((24, 1), full),                 # resident accumulators
                pl.BlockSpec((24, 1), full),
            ],
        ),
        out_shape=(
            jax.ShapeDtypeStruct((24, 1), jnp.float32),
            jax.ShapeDtypeStruct((24, 1), jnp.float32),
        ),
        compiler_params=pltpu.CompilerParams(
            dimension_semantics=("arbitrary",),              # cross-tile BN reduction
            vmem_limit_bytes=_VMEM_LIMIT),
    )(n_dev, xT, params["A_T"], params["cb_T"])

    # BatchNorm2d (training-mode batch statistics) folded into fc1's affine.
    # Tiny (<= 24x12) data-dependent XLA ops between the two passes.
    count = n_dev[0].astype(jnp.float32) * 4.0               # N * H * W per channel
    mean6 = s24.reshape(6, 4).sum(axis=1) / count
    var6 = sq24.reshape(6, 4).sum(axis=1) / count - mean6 * mean6      # biased
    scale6 = params["gamma"] * jax.lax.rsqrt(var6 + EPS)
    shift6 = params["beta"] - mean6 * scale6
    scale24 = jnp.repeat(scale6, 4)
    shift24 = jnp.repeat(shift6, 4)
    w1_eff = params["w1"] * scale24[None, :]                            # (12, 24)
    b1_eff = params["w1"] @ shift24.reshape(24, 1) + params["b1"]       # (12, 1)

    outT = pl.pallas_call(
        _mlp_kernel,
        grid=(num_tiles,),
        in_specs=[
            pl.BlockSpec((9, tile), lambda i: (0, i)),
            pl.BlockSpec((96, 9), lambda i: (0, 0)),
            pl.BlockSpec((96, 1), lambda i: (0, 0)),
            pl.BlockSpec((12, 24), lambda i: (0, 0)),
            pl.BlockSpec((12, 1), lambda i: (0, 0)),
            pl.BlockSpec((4, 12), lambda i: (0, 0)),
            pl.BlockSpec((4, 1), lambda i: (0, 0)),
        ],
        out_specs=pl.BlockSpec((4, tile), lambda i: (0, i)),
        out_shape=jax.ShapeDtypeStruct((4, N), jnp.float32),
        compiler_params=pltpu.CompilerParams(
            dimension_semantics=("parallel",),               # both TCs on v7x
            vmem_limit_bytes=_VMEM_LIMIT),
    )(xT, params["A_T"], params["cb_T"], w1_eff, b1_eff, params["w2"], params["b2"])

    return outT.T                                            # (N, 4)


def init_params(key):
    k1, k2, k3, k4, k5, k6 = jax.random.split(key, 6)
    # PyTorch layouts.
    conv_w = jax.random.normal(k1, (6, 1, 2, 2), jnp.float32) * 0.5   # (O,I,kh,kw)
    conv_b = jax.random.normal(k2, (6,), jnp.float32) * 0.1
    fc1_w = jax.random.normal(k3, (12, 24), jnp.float32) * 0.2        # (out, in)
    fc1_b = jax.random.normal(k4, (12,), jnp.float32) * 0.1
    fc2_w = jax.random.normal(k5, (4, 12), jnp.float32) * 0.2
    fc2_b = jax.random.normal(k6, (4,), jnp.float32) * 0.1
    gamma = jnp.ones((6,), jnp.float32)      # BatchNorm2d default init
    beta = jnp.zeros((6,), jnp.float32)

    # Pack conv1 (pad=1, 2x2 kernel, 3x3 input -> 4x4 output) into a constant
    # (9, 96) matrix.  Column j = dh*48 + dw*24 + c*4 + ph*2 + pw corresponds
    # to conv output (c, oh=2*ph+dh, ow=2*pw+dw).  Transposed to (96, 9) for
    # the feature-major kernels.  O(1) size, batch-independent.
    src = np.zeros((9, 96), np.int32)
    valid = np.zeros((9, 96), np.float32)
    cidx = np.zeros((96,), np.int32)
    for c in range(6):
        for ph in range(2):
            for pw in range(2):
                for dh in range(2):
                    for dw in range(2):
                        oh, ow = 2 * ph + dh, 2 * pw + dw
                        j = dh * 48 + dw * 24 + c * 4 + ph * 2 + pw
                        cidx[j] = c
                        for kh in range(2):
                            for kw in range(2):
                                ih, iw = oh + kh - 1, ow + kw - 1
                                if 0 <= ih <= 2 and 0 <= iw <= 2:
                                    src[ih * 3 + iw, j] = c * 4 + kh * 2 + kw
                                    valid[ih * 3 + iw, j] = 1.0
    A = conv_w.reshape(24)[jnp.asarray(src)] * jnp.asarray(valid)     # (9, 96)

    return {
        "A_T": A.T,                                   # (96, 9)
        "cb_T": conv_b[jnp.asarray(cidx)].reshape(96, 1),
        "conv_w": conv_w, "conv_b": conv_b,           # raw, for the reference
        "gamma": gamma, "beta": beta,
        "w1": fc1_w, "b1": fc1_b.reshape(12, 1),      # PyTorch (out, in) layouts
        "w2": fc2_w, "b2": fc2_b.reshape(4, 1),
    }


def _reference_forward(x, params):
    """Pure-JAX mirror of the PyTorch Net forward (training-mode BN)."""
    y = jax.lax.conv_general_dilated(
        x, params["conv_w"], window_strides=(1, 1), padding=((1, 1), (1, 1)),
        dimension_numbers=("NCHW", "OIHW", "NCHW"))
    y = y + params["conv_b"].reshape(1, 6, 1, 1)
    y = jnp.maximum(y, 0.0)
    y = y.reshape(x.shape[0], 6, 2, 2, 2, 2).mean(axis=(3, 5))   # AvgPool2d(2,2)
    mean = y.mean(axis=(0, 2, 3), keepdims=True)
    var = ((y - mean) ** 2).mean(axis=(0, 2, 3), keepdims=True)
    y = (y - mean) * jax.lax.rsqrt(var + EPS)
    y = y * params["gamma"].reshape(1, 6, 1, 1) + params["beta"].reshape(1, 6, 1, 1)
    y = y.reshape(x.shape[0], 24)
    h = jnp.maximum(y @ params["w1"].T + params["b1"].reshape(1, 12), 0.0)
    return h @ params["w2"].T + params["b2"].reshape(1, 4)


if __name__ == "__main__":
    key = jax.random.PRNGKey(0)
    pkey, xkey = jax.random.split(key)
    params = init_params(pkey)
    x = jax.random.normal(xkey, (2, 1, 3, 3), jnp.float32)   # NCHW, as in PyTorch
    y = net_forward(x, params)
    jax.block_until_ready(y)
    assert y.shape == (2, 4) and y.dtype == jnp.float32

    y_ref = _reference_forward(x, params)
    np.testing.assert_allclose(np.asarray(y), np.asarray(y_ref),
                               rtol=2e-2, atol=2e-2)
    print("KERNEL_OK")
</pallas_src>

<mosaic_0001>
module attributes {stable_mosaic.version = 11 : i64} {
  func.func @_stats_kernel(%arg0: i32, %arg1: memref<1xi32, #tpu.memory_space<smem>>, %arg2: memref<9x2xf32, #tpu.memory_space<vmem>>, %arg3: memref<96x9xf32, #tpu.memory_space<vmem>>, %arg4: memref<96x1xf32, #tpu.memory_space<vmem>>, %arg5: memref<24x1xf32, #tpu.memory_space<vmem>>, %arg6: memref<24x1xf32, #tpu.memory_space<vmem>>) attributes {dimension_semantics = [#tpu.dimension_semantics<arbitrary>], iteration_bounds = array<i64: 1>, scalar_prefetch = 1 : i64, scratch_operands = 0 : i64, tpu.core_type = #tpu.core_type<tc>, window_params = [{transform_indices = @transform_0, window_bounds = array<i64: 9, 2>}, {pipeline_mode = #tpu.pipeline_mode<synchronous>, transform_indices = @transform_1, window_bounds = array<i64: 96, 9>}, {pipeline_mode = #tpu.pipeline_mode<synchronous>, transform_indices = @transform_2, window_bounds = array<i64: 96, 1>}, {pipeline_mode = #tpu.pipeline_mode<synchronous>, transform_indices = @transform_3, window_bounds = array<i64: 24, 1>}, {pipeline_mode = #tpu.pipeline_mode<synchronous>, transform_indices = @transform_4, window_bounds = array<i64: 24, 1>}]} {
    %c0_i32 = arith.constant 0 : i32
    %0 = arith.cmpi eq, %arg0, %c0_i32 : i32
    %1 = arith.extui %0 : i1 to i32
    %c0_i32_0 = arith.constant 0 : i32
    %2 = arith.cmpi ne, %1, %c0_i32_0 : i32
    scf.if %2 {
      %cst_11 = arith.constant 0.000000e+00 : f32
      %26 = vector.broadcast %cst_11 : f32 to vector<24x1xf32>
      %c0_12 = arith.constant 0 : index
      %c0_13 = arith.constant 0 : index
      %27 = vector.load %arg5[%c0_12, %c0_13] : memref<24x1xf32, #tpu.memory_space<vmem>>, vector<24x1xf32>
      tpu.vector_store %arg5[%c0_12, %c0_13], %26 {strides = array<i32>} : memref<24x1xf32, #tpu.memory_space<vmem>>, vector<24x1xf32>,
      %cst_14 = arith.constant 0.000000e+00 : f32
      %28 = vector.broadcast %cst_14 : f32 to vector<24x1xf32>
      %c0_15 = arith.constant 0 : index
      %c0_16 = arith.constant 0 : index
      %29 = vector.load %arg6[%c0_15, %c0_16] : memref<24x1xf32, #tpu.memory_space<vmem>>, vector<24x1xf32>
      tpu.vector_store %arg6[%c0_15, %c0_16], %28 {strides = array<i32>} : memref<24x1xf32, #tpu.memory_space<vmem>>, vector<24x1xf32>,
    } else {
    }
    %c0 = arith.constant 0 : index
    %c0_1 = arith.constant 0 : index
    %3 = vector.load %arg3[%c0, %c0_1] : memref<96x9xf32, #tpu.memory_space<vmem>>, vector<96x9xf32>
    %c0_2 = arith.constant 0 : index
    %c0_3 = arith.constant 0 : index
    %4 = vector.load %arg2[%c0_2, %c0_3] : memref<9x2xf32, #tpu.memory_space<vmem>>, vector<9x2xf32>
    %cst = arith.constant dense<0.000000e+00> : vector<96x2xf32>
    %5 = tpu.matmul %3, %4, %cst {dimension_numbers = #tpu.dot_dimension_numbers<[1], [0], [0], [1], [0, 0, 1, 1], [], []>} : vector<96x9xf32>, vector<9x2xf32>, vector<96x2xf32> -> vector<96x2xf32>
    %c0_4 = arith.constant 0 : index
    %c0_5 = arith.constant 0 : index
    %6 = vector.load %arg4[%c0_4, %c0_5] : memref<96x1xf32, #tpu.memory_space<vmem>>, vector<96x1xf32>
    %7 = vector.broadcast %6 : vector<96x1xf32> to vector<96x2xf32>
    %8 = arith.addf %5, %7 : vector<96x2xf32>
    %cst_6 = arith.constant 0.000000e+00 : f32
    %9 = vector.broadcast %cst_6 : f32 to vector<96x2xf32>
    %10 = arith.maximumf %8, %9 : vector<96x2xf32>
    %11 = vector.extract_strided_slice %10 {offsets = [0, 0], sizes = [24, 2], strides = [1, 1]} : vector<96x2xf32> to vector<24x2xf32>
    %12 = vector.extract_strided_slice %10 {offsets = [24, 0], sizes = [24, 2], strides = [1, 1]} : vector<96x2xf32> to vector<24x2xf32>
    %13 = arith.addf %11, %12 : vector<24x2xf32>
    %14 = vector.extract_strided_slice %10 {offsets = [48, 0], sizes = [24, 2], strides = [1, 1]} : vector<96x2xf32> to vector<24x2xf32>
    %15 = arith.addf %13, %14 : vector<24x2xf32>
    %16 = vector.extract_strided_slice %10 {offsets = [72, 0], sizes = [24, 2], strides = [1, 1]} : vector<96x2xf32> to vector<24x2xf32>
    %17 = arith.addf %15, %16 : vector<24x2xf32>
    %cst_7 = arith.constant 2.500000e-01 : f32
    %18 = vector.broadcast %cst_7 : f32 to vector<24x2xf32>
    %19 = arith.mulf %18, %17 : vector<24x2xf32>
    %c0_i32_8 = arith.constant 0 : i32
    %20 = arith.cmpi eq, %arg0, %c0_i32_8 : i32
    %true = arith.constant true
    %21 = arith.xori %20, %true : i1
    %22 = arith.extui %21 : i1 to i32
    %c0_i32_9 = arith.constant 0 : i32
    %23 = arith.cmpi ne, %22, %c0_i32_9 : i32
    scf.if %23 {
      %c0_11 = arith.constant 0 : index
      %c0_12 = arith.constant 0 : index
      %26 = vector.load %arg5[%c0_11, %c0_12] : memref<24x1xf32, #tpu.memory_space<vmem>>, vector<24x1xf32>
      %cst_13 = arith.constant dense<0.000000e+00> : vector<24xf32>
      %27 = vector.multi_reduction <add>, %19, %cst_13 [1] : vector<24x2xf32> to vector<24xf32>
      %28 = vector.shape_cast %27 : vector<24xf32> to vector<24x1xf32>
      %29 = arith.addf %26, %28 : vector<24x1xf32>
      %c0_14 = arith.constant 0 : index
      %c0_15 = arith.constant 0 : index
      %30 = vector.load %arg5[%c0_14, %c0_15] : memref<24x1xf32, #tpu.memory_space<vmem>>, vector<24x1xf32>
      tpu.vector_store %arg5[%c0_14, %c0_15], %29 {strides = array<i32>} : memref<24x1xf32, #tpu.memory_space<vmem>>, vector<24x1xf32>,
      %c0_16 = arith.constant 0 : index
      %c0_17 = arith.constant 0 : index
      %31 = vector.load %arg6[%c0_16, %c0_17] : memref<24x1xf32, #tpu.memory_space<vmem>>, vector<24x1xf32>
      %32 = arith.mulf %19, %19 : vector<24x2xf32>
      %cst_18 = arith.constant dense<0.000000e+00> : vector<24xf32>
      %33 = vector.multi_reduction <add>, %32, %cst_18 [1] : vector<24x2xf32> to vector<24xf32>
      %34 = vector.shape_cast %33 : vector<24xf32> to vector<24x1xf32>
      %35 = arith.addf %31, %34 : vector<24x1xf32>
      %c0_19 = arith.constant 0 : index
      %c0_20 = arith.constant 0 : index
      %36 = vector.load %arg6[%c0_19, %c0_20] : memref<24x1xf32, #tpu.memory_space<vmem>>, vector<24x1xf32>
      tpu.vector_store %arg6[%c0_19, %c0_20], %35 {strides = array<i32>} : memref<24x1xf32, #tpu.memory_space<vmem>>, vector<24x1xf32>,
    } else {
    }
    %24 = arith.extui %20 : i1 to i32
    %c0_i32_10 = arith.constant 0 : i32
    %25 = arith.cmpi ne, %24, %c0_i32_10 : i32
    scf.if %25 {
      %26 = tpu.iota {dimensions = array<i32: 1>} : vector<24x2xi32>
      %c0_11 = arith.constant 0 : index
      %27 = memref.load %arg1[%c0_11] : memref<1xi32, #tpu.memory_space<smem>>
      %c2_i32 = arith.constant 2 : i32
      %28 = arith.muli %arg0, %c2_i32 : i32
      %29 = arith.subi %27, %28 : i32
      %30 = vector.broadcast %29 : i32 to vector<24x2xi32>
      %31 = arith.cmpi slt, %26, %30 : vector<24x2xi32>
      %cst_12 = arith.constant 0.000000e+00 : f32
      %32 = vector.broadcast %cst_12 : f32 to vector<24x2xf32>
      %33 = arith.select %31, %19, %32 : vector<24x2xi1>, vector<24x2xf32>
      %34 = arith.mulf %19, %19 : vector<24x2xf32>
      %cst_13 = arith.constant 0.000000e+00 : f32
      %35 = vector.broadcast %cst_13 : f32 to vector<24x2xf32>
      %36 = arith.select %31, %34, %35 : vector<24x2xi1>, vector<24x2xf32>
      %c0_14 = arith.constant 0 : index
      %c0_15 = arith.constant 0 : index
      %37 = vector.load %arg5[%c0_14, %c0_15] : memref<24x1xf32, #tpu.memory_space<vmem>>, vector<24x1xf32>
      %cst_16 = arith.constant dense<0.000000e+00> : vector<24xf32>
      %38 = vector.multi_reduction <add>, %33, %cst_16 [1] : vector<24x2xf32> to vector<24xf32>
      %39 = vector.shape_cast %38 : vector<24xf32> to vector<24x1xf32>
      %40 = arith.addf %37, %39 : vector<24x1xf32>
      %c0_17 = arith.constant 0 : index
      %c0_18 = arith.constant 0 : index
      %41 = vector.load %arg5[%c0_17, %c0_18] : memref<24x1xf32, #tpu.memory_space<vmem>>, vector<24x1xf32>
      tpu.vector_store %arg5[%c0_17, %c0_18], %40 {strides = array<i32>} : memref<24x1xf32, #tpu.memory_space<vmem>>, vector<24x1xf32>,
      %c0_19 = arith.constant 0 : index
      %c0_20 = arith.constant 0 : index
      %42 = vector.load %arg6[%c0_19, %c0_20] : memref<24x1xf32, #tpu.memory_space<vmem>>, vector<24x1xf32>
      %cst_21 = arith.constant dense<0.000000e+00> : vector<24xf32>
      %43 = vector.multi_reduction <add>, %36, %cst_21 [1] : vector<24x2xf32> to vector<24xf32>
      %44 = vector.shape_cast %43 : vector<24xf32> to vector<24x1xf32>
      %45 = arith.addf %42, %44 : vector<24x1xf32>
      %c0_22 = arith.constant 0 : index
      %c0_23 = arith.constant 0 : index
      %46 = vector.load %arg6[%c0_22, %c0_23] : memref<24x1xf32, #tpu.memory_space<vmem>>, vector<24x1xf32>
      tpu.vector_store %arg6[%c0_22, %c0_23], %45 {strides = array<i32>} : memref<24x1xf32, #tpu.memory_space<vmem>>, vector<24x1xf32>,
    } else {
    }
    return
  }
  func.func @transform_0(%arg0: i32, %arg1: memref<1xi32, #tpu.memory_space<smem>>) -> (i32, i32) {
    %c0_i32 = arith.constant 0 : i32
    %c0_i32_0 = arith.constant 0 : i32
    return %c0_i32, %arg0 : i32, i32
  }
  func.func @transform_1(%arg0: i32, %arg1: memref<1xi32, #tpu.memory_space<smem>>) -> (i32, i32) {
    %c0_i32 = arith.constant 0 : i32
    %c0_i32_0 = arith.constant 0 : i32
    %c0_i32_1 = arith.constant 0 : i32
    return %c0_i32, %c0_i32_0 : i32, i32
  }
  func.func @transform_2(%arg0: i32, %arg1: memref<1xi32, #tpu.memory_space<smem>>) -> (i32, i32) {
    %c0_i32 = arith.constant 0 : i32
    %c0_i32_0 = arith.constant 0 : i32
    %c0_i32_1 = arith.constant 0 : i32
    return %c0_i32, %c0_i32_0 : i32, i32
  }
  func.func @transform_3(%arg0: i32, %arg1: memref<1xi32, #tpu.memory_space<smem>>) -> (i32, i32) {
    %c0_i32 = arith.constant 0 : i32
    %c0_i32_0 = arith.constant 0 : i32
    %c0_i32_1 = arith.constant 0 : i32
    return %c0_i32, %c0_i32_0 : i32, i32
  }
  func.func @transform_4(%arg0: i32, %arg1: memref<1xi32, #tpu.memory_space<smem>>) -> (i32, i32) {
    %c0_i32 = arith.constant 0 : i32
    %c0_i32_0 = arith.constant 0 : i32
    %c0_i32_1 = arith.constant 0 : i32
    return %c0_i32, %c0_i32_0 : i32, i32
  }
}

</mosaic_0001>

<bundles_post_ra>
// kernel: tpu_custom_call.1
= control target key start
LH: loop header
LB: loop body
LE: loop exit
PB: predicated region body
PF: predicated region fallthrough
CT: control target
= control target key end

     0   :  { %vm152_vm0 = vcmask 1040384   ;;  %v367_v0 = vmov 0   ;;  %vm115_vm1 = vcmask 72704   ;;  %v281_v43 = vlaneseq  ;;  %s580_s3 = inlined_call_operand.vmem [shape: f32[96,1], index: 3, kind: input, shape index: {}]   ;;  %s581_s1 = inlined_call_operand.vmem [shape: f32[9,2], index: 1, kind: input, shape index: {}]   ;;  %s582_s2 = inlined_call_operand.vmem [shape: f32[96,9], index: 2, kind: input, shape index: {}]   ;;  %s583_s0 = inlined_call_operand.<no memory space> [shape: s32[1], index: 0, kind: input, shape index: {}]   ;;  %s584_s4 = inlined_call_operand.vmem [shape: f32[24,1], index: 4, kind: output, shape index: {0}]   ;;  %s585_s5 = inlined_call_operand.vmem [shape: f32[24,1], index: 5, kind: output, shape index: {1}]  }
   0x1   :  { %365 = vset.pattern.permute.xlu1 %v367_v0  ;;  %364 = vset.pattern.permute.xlu0 %v367_v0  ;;  %v45_v1 = vld [vmem:[%s580_s3 + $0x10] sm:$0xff]  ;;  %v43_v2 = vld [vmem:[%s580_s3] sm:$0xff]  ;;  %v42_v3 = vld [vmem:[%s581_s1 + $0x8] sm:$0x1]  ;;  %v286_v54 = vstv %s583_s0  ;;  %vm22_vm2 = vcmask 7168   ;;  %v368_v60 = vmov 0.0  }
   0x2   :  { %67 = vperm.xlu1 %365, %v45_v1   ;;  %57 = vperm.xlu0 %364, %v43_v2   ;;  %v41_v4 = vld [vmem:[%s581_s1] sm:$0xff]  ;;  %v32_v6 = vld [vmem:[%s582_s2 + $0x18] sm:$0xff]  ;;  %v35_v7 = vld [vmem:[%s582_s2 + $0x30] sm:$0xff]  ;;  %v282_v53 = vand.u32 127, %v281_v43  ;;  %23 = vst.msk [vmem:[%s584_s4] sm:$0xff] %vm22_vm2, %v368_v60  ;;  %vm300_vm4 = vcmask 15360  }
   0x3   :  { %343 = vmatpush.msk.msra.mxu0 %vm152_vm0, %v42_v3  ;;  %356 = vmatpush.msk.msra.mxu1 %vm152_vm0, %v42_v3  ;;  %v29_v5 = vld [vmem:[%s582_s2] sm:$0xff]  ;;  %v38_v8 = vld [vmem:[%s582_s2 + $0x48] sm:$0xff]  ;;  %v46_v9 = vld [vmem:[%s580_s3 + $0x18] sm:$0xff]  ;;  %24 = vst.msk [vmem:[%s584_s4 + $0x8] sm:$0xff] %vm22_vm2, %v368_v60 }
   0x4   :  { %357 = vmatpush.msk.msra.mxu2 %vm152_vm0, %v42_v3  ;;  %358 = vmatpush.msk.msra.mxu3 %vm152_vm0, %v42_v3  ;;  %v44_v10 = vld [vmem:[%s580_s3 + $0x8] sm:$0xff]  ;;  %v47_v11 = vld [vmem:[%s580_s3 + $0x20] sm:$0xff]  ;;  %v36_v14 = vld [vmem:[%s582_s2 + $0x38] sm:$0xff]  ;;  %vm500_vm3 = vcmp.lt.s32.totalorder %v282_v53, %v286_v54  ;;  %25 = vst.msk [vmem:[%s584_s4 + $0x10] sm:$0xff] %vm22_vm2, %v368_v60 }
   0x5   :  { %171 = vmatpush.msra.mxu0 %v41_v4  ;;  %359 = vmatpush.msra.mxu1 %v41_v4  ;;  %v30_v12 = vld [vmem:[%s582_s2 + $0x8] sm:$0xff]  ;;  %v33_v13 = vld [vmem:[%s582_s2 + $0x20] sm:$0xff]  ;;  %v39_v15 = vld [vmem:[%s582_s2 + $0x50] sm:$0xff]  ;;  %27 = vst.msk [vmem:[%s585_s5 + $0x8] sm:$0xff] %vm22_vm2, %v368_v60 }
   0x6   :  { %360 = vmatpush.msra.mxu2 %v41_v4  ;;  %361 = vmatpush.msra.mxu3 %v41_v4  ;;  %v50_v16 = vld [vmem:[%s580_s3 + $0x38] sm:$0xff]  ;;  %v49_v17 = vld [vmem:[%s580_s3 + $0x30] sm:$0xff]  ;;  %v48_v18 = vld [vmem:[%s580_s3 + $0x28] sm:$0xff]  ;;  %26 = vst.msk [vmem:[%s585_s5] sm:$0xff] %vm22_vm2, %v368_v60 }
   0x7   :  { %344 = vmatmul.msk.f32.vlgmr.msra.gmra.mxu0 %vm115_vm1, %v29_v5  ;;  %347 = vmatmul.msk.f32.vlgmr.msra.gmra.mxu1 %vm115_vm1, %v32_v6  ;;  %v31_v19 = vld [vmem:[%s582_s2 + $0x10] sm:$0xff]  ;;  %v34_v20 = vld [vmem:[%s582_s2 + $0x28] sm:$0xff]  ;;  %v37_v21 = vld [vmem:[%s582_s2 + $0x40] sm:$0xff]  ;;  %28 = vst.msk [vmem:[%s585_s5 + $0x10] sm:$0xff] %vm22_vm2, %v368_v60 }
   0x8   :  { %350 = vmatmul.msk.f32.vlgmr.msra.gmra.mxu2 %vm115_vm1, %v35_v7  ;;  %353 = vmatmul.msk.f32.vlgmr.msra.gmra.mxu3 %vm115_vm1, %v38_v8  ;;  %v40_v22 = vld [vmem:[%s582_s2 + $0x58] sm:$0xff]  ;;  %v53_v23 = vld [vmem:[%s580_s3 + $0x50] sm:$0xff]  ;;  %v52_v24 = vld [vmem:[%s580_s3 + $0x48] sm:$0xff] }
   0x9   :  { %366 = vset.pattern.permute.xlu2 %v367_v0  ;;  %v51_v25 = vld [vmem:[%s580_s3 + $0x40] sm:$0xff]  ;;  %v54_v26 = vld [vmem:[%s580_s3 + $0x58] sm:$0xff] }
   0xa   :  { %72 = vperm.xlu1 %365, %v46_v9   ;;  %62 = vperm.xlu0 %364, %v44_v10   ;;  %v297_v43 = vld [vmem:[%s584_s4] sm:$0xff] }
   0xb   :  { %77 = vperm.xlu2 %366, %v47_v11  }
   0xe   :  { %v319_v54 = vld [vmem:[%s585_s5 + $0x10] sm:$0xff] }
   0xf   :  { %345 = vmatmul.msk.f32.gmra.mxu0 %vm115_vm1, %v30_v12  ;;  %348 = vmatmul.msk.f32.gmra.mxu1 %vm115_vm1, %v33_v13 }
  0x10   :  { %351 = vmatmul.msk.f32.gmra.mxu2 %vm115_vm1, %v36_v14  ;;  %354 = vmatmul.msk.f32.gmra.mxu3 %vm115_vm1, %v39_v15 }
  0x12   :  { %92 = vperm.xlu1 %365, %v50_v16   ;;  %87 = vperm.xlu0 %364, %v49_v17  }
  0x13   :  { %82 = vperm.xlu2 %366, %v48_v18  }
  0x17   :  { %346 = vmatmul.msk.f32.gmra.mxu0 %vm115_vm1, %v31_v19  ;;  %349 = vmatmul.msk.f32.gmra.mxu1 %vm115_vm1, %v34_v20 }
  0x18   :  { %352 = vmatmul.msk.f32.gmra.mxu2 %vm115_vm1, %v37_v21  ;;  %355 = vmatmul.msk.f32.gmra.mxu3 %vm115_vm1, %v40_v22 }
  0x1a   :  { %107 = vperm.xlu1 %365, %v53_v23   ;;  %102 = vperm.xlu0 %364, %v52_v24  }
  0x1b   :  { %97 = vperm.xlu2 %366, %v51_v25  }
  0x23   :  { %112 = vperm.xlu2 %366, %v54_v26  }
  0x65   :  { %v78_v29 = vpop.permute.xlu2 %77 }
  0x6d   :  { %v83_v35 = vpop.permute.xlu2 %82 }
  0x74   :  { %v68_v27 = vpop.permute.xlu1 %67  ;;  %v58_v28 = vpop.permute.xlu0 %57 }
  0x75   :  { %v98_v55 = vpop.permute.xlu2 %97 }
  0x7c   :  { %v63_v30 = vpop.permute.xlu0 %62  ;;  %v73_v31 = vpop.permute.xlu1 %72 }
  0x7d   :  { %v113_v15 = vpop.permute.xlu2 %112 }
  0x84   :  { %v173_v32 = vpop.f32.mrf.mxu0  ;;  %v182_v33 = vpop.f32.mrf.mxu1 }
  0x85   :  { %v88_v34 = vpop.permute.xlu0 %87  ;;  %v174_v36 = vadd.f32 %v173_v32, %v58_v28  ;;  %v183_v37 = vadd.f32 %v182_v33, %v73_v31  ;;  %v93_v38 = vpop.permute.xlu1 %92 }
  0x87   :  { %v209_v39 = vmax.f32 %v174_v36, 0.0  ;;  %v212_v40 = vmax.f32 %v183_v37, 0.0 }
  0x89   :  { %v221_v50 = vadd.f32 %v212_v40, %v209_v39 }
  0x8b   :  { %v191_v41 = vpop.f32.mrf.mxu2  ;;  %v200_v42 = vpop.f32.mrf.mxu3 }
  0x8c   :  { %v192_v44 = vadd.f32 %v191_v41, %v88_v34  ;;  %v176_v45 = vpop.f32.mrf.mxu0  ;;  %v185_v46 = vpop.f32.mrf.mxu1 }
  0x8d   :  { %v177_v47 = vadd.f32 %v176_v45, %v63_v30  ;;  %v186_v48 = vadd.f32 %v185_v46, %v78_v29  ;;  %v103_v49 = vpop.permute.xlu0 %102  ;;  %v108_v61 = vpop.permute.xlu1 %107  ;;  %v298_v46 = vld [vmem:[%s584_s4 + $0x8] sm:$0xff] }
  0x8e   :  { %v215_v51 = vmax.f32 %v192_v44, 0.0  ;;  %v201_v52 = vadd.f32 %v200_v42, %v103_v49 }
  0x8f   :  { %v210_v58 = vmax.f32 %v177_v47, 0.0  ;;  %v213_v59 = vmax.f32 %v186_v48, 0.0  ;;  %v318_v48 = vld [vmem:[%s585_s5 + $0x8] sm:$0xff] }
  0x90   :  { %v224_v56 = vadd.f32 %v221_v50, %v215_v51  ;;  %v218_v57 = vmax.f32 %v201_v52, 0.0  ;;  %v299_v52 = vld [vmem:[%s584_s4 + $0x10] sm:$0xff] }
  0x91   :  { %v222_v7 = vadd.f32 %v213_v59, %v210_v58  ;;  %v317_v58 = vld [vmem:[%s585_s5] sm:$0xff] }
  0x92   :  { %v227_v62 = vadd.f32 %v224_v56, %v218_v57 }
  0x93   :  { %v194_v63 = vpop.f32.mrf.mxu2  ;;  %v203_v0 = vpop.f32.mrf.mxu3 }
  0x94   :  { %v195_v2 = vadd.f32 %v194_v63, %v93_v38  ;;  %v204_v3 = vadd.f32 %v203_v0, %v108_v61  ;;  %v179_v4 = vpop.f32.mrf.mxu0  ;;  %v188_v5 = vpop.f32.mrf.mxu1  ;;  %v230_v6 = vmul.f32 0.25, %v227_v62 }
  0x95   :  { %v180_v9 = vadd.f32 %v179_v4, %v68_v27  ;;  %v189_v10 = vadd.f32 %v188_v5, %v83_v35 }
  0x96   :  { %v216_v8 = vmax.f32 %v195_v2, 0.0  ;;  %v288_v11 = vsel %vm500_vm3, %v230_v6, 0.0  ;;  %v219_v14 = vmax.f32 %v204_v3, 0.0  ;;  %v291_v39 = vmul.f32 %v230_v6, %v230_v6 }
  0x97   :  { %v301_v12 = vsel %vm300_vm4, %v288_v11, 0.0  ;;  %v211_v17 = vmax.f32 %v180_v9, 0.0  ;;  %v214_v18 = vmax.f32 %v189_v10, 0.0 }
  0x98   :  { %v225_v13 = vadd.f32 %v222_v7, %v216_v8  ;;  %302 = vadd.xlane.f32.xlu0 %v301_v12  ;;  %v294_v41 = vsel %vm500_vm3, %v291_v39, 0.0 }
  0x99   :  { %v223_v24 = vadd.f32 %v214_v18, %v211_v17  ;;  %v320_v42 = vsel %vm300_vm4, %v294_v41, 0.0 }
  0x9a   :  { %v228_v16 = vadd.f32 %v225_v13, %v219_v14 }
  0x9b   :  { %v197_v19 = vpop.f32.mrf.mxu2  ;;  %v206_v20 = vpop.f32.mrf.mxu3 }
  0x9c   :  { %v198_v21 = vadd.f32 %v197_v19, %v98_v55  ;;  %v207_v22 = vadd.f32 %v206_v20, %v113_v15  ;;  %v231_v23 = vmul.f32 0.25, %v228_v16 }
  0x9e   :  { %v217_v25 = vmax.f32 %v198_v21, 0.0  ;;  %v289_v26 = vsel %vm500_vm3, %v231_v23, 0.0  ;;  %v292_v27 = vmul.f32 %v231_v23, %v231_v23  ;;  %v220_v30 = vmax.f32 %v207_v22, 0.0 }
  0x9f   :  { %v304_v28 = vsel %vm300_vm4, %v289_v26, 0.0 }
  0xa0   :  { %v226_v29 = vadd.f32 %v223_v24, %v217_v25  ;;  %305 = vadd.xlane.f32.xlu1 %v304_v28  ;;  %v295_v31 = vsel %vm500_vm3, %v292_v27, 0.0 }
  0xa1   :  { %v323_v32 = vsel %vm300_vm4, %v295_v31, 0.0 }
  0xa2   :  { %v229_v33 = vadd.f32 %v226_v29, %v220_v30  ;;  %324 = vadd.xlane.f32.xlu0 %v323_v32 }
  0xa4   :  { %v232_v34 = vmul.f32 0.25, %v229_v33 }
  0xa6   :  { %v290_v35 = vsel %vm500_vm3, %v232_v34, 0.0  ;;  %v293_v36 = vmul.f32 %v232_v34, %v232_v34 }
  0xa7   :  { %v307_v37 = vsel %vm300_vm4, %v290_v35, 0.0 }
  0xa8   :  { %308 = vadd.xlane.f32.xlu2 %v307_v37  ;;  %v296_v38 = vsel %vm500_vm3, %v293_v36, 0.0 }
  0xa9   :  { %v326_v40 = vsel %vm300_vm4, %v296_v38, 0.0 }
  0xaa   :  { %327 = vadd.xlane.f32.xlu1 %v326_v40 }
  0xb0   :  { %321 = vadd.xlane.f32.xlu2 %v320_v42 }
 0x10b   :  { %v303_v44 = vpop.xlane.xlu0 %302 }
 0x10c   :  { %v310_v45 = vadd.f32 %v303_v44, %v297_v43 }
 0x10e   :  { %314 = vst.msk [vmem:[%s584_s4] sm:$0xff] %vm22_vm2, %v310_v45 }
 0x113   :  { %v306_v47 = vpop.xlane.xlu1 %305 }
 0x114   :  { %v311_v49 = vadd.f32 %v306_v47, %v298_v46 }
 0x115   :  { %v325_v50 = vpop.xlane.xlu0 %324 }
 0x116   :  { %315 = vst.msk [vmem:[%s584_s4 + $0x8] sm:$0xff] %vm22_vm2, %v311_v49  ;;  %v330_v51 = vadd.f32 %v325_v50, %v318_v48 }
 0x118   :  { %333 = vst.msk [vmem:[%s585_s5 + $0x8] sm:$0xff] %vm22_vm2, %v330_v51 }
 0x11b   :  { %v309_v53 = vpop.xlane.xlu2 %308 }
 0x11c   :  { %v312_v55 = vadd.f32 %v309_v53, %v299_v52 }
 0x11d   :  { %v328_v56 = vpop.xlane.xlu1 %327 }
 0x11e   :  { %316 = vst.msk [vmem:[%s584_s4 + $0x10] sm:$0xff] %vm22_vm2, %v312_v55  ;;  %v331_v57 = vadd.f32 %v328_v56, %v319_v54 }
 0x120   :  { %334 = vst.msk [vmem:[%s585_s5 + $0x10] sm:$0xff] %vm22_vm2, %v331_v57 }
 0x123   :  { %v322_v59 = vpop.xlane.xlu2 %321 }
 0x124   :  { %v329_v60 = vadd.f32 %v322_v59, %v317_v58 }
 0x126   :  { %332 = vst.msk [vmem:[%s585_s5] sm:$0xff] %vm22_vm2, %v329_v60 }

</bundles_post_ra>
